<compile_context>
chip_gen: v6e
topology: v6e:2x2x1
jax: 0.10.0
libtpu: 0.0.40
codegen_flags: <defaults>
</compile_context>

<pallas_src>
import functools

import jax
import jax.numpy as jnp
import numpy as np
from jax.experimental import pallas as pl
from jax.experimental.pallas import tpu as pltpu

LANE = 128


def _round_up(n, m):
    return ((n + m - 1) // m) * m


def _pad2(a, rows, cols, dtype):
    out = jnp.zeros((rows, cols), dtype)
    return out.at[: a.shape[0], : a.shape[1]].set(a.astype(dtype))


# ----------------------------------------------------------------------------
# Kernel
# ----------------------------------------------------------------------------
def vae_kernel(x_ref,
               w13_ref, b13_ref,   # fused [W1 | W3x], [b1 | b3]
               w2_ref, b2_ref,     # encoder layer 2 -> zm
               w3z_ref,            # decoder layer 1, zm part
               w4_ref, b4_ref,     # decoder layer 2 -> x_hat
               out_ref, *, hp):
    x = x_ref[...]                                              # bf16 (tb, D)

    # Fused x-side matmul: [x@W1+b1 | x@W3x+b3] in one N=2*hp dot.
    hx = jnp.dot(x, w13_ref[...], preferred_element_type=jnp.float32) + b13_ref[...]
    h = jnp.maximum(hx[:, :hp], 0.0).astype(x.dtype)            # encoder hidden (ReLU)
    dx = hx[:, hp:]                                             # x@W3x + b3 (f32, pre-ReLU)

    # Encoder layer 2 -> latent mean zm.
    zm = jnp.dot(h, w2_ref[...], preferred_element_type=jnp.float32) + b2_ref[...]
    zm = zm.astype(x.dtype)

    # Decoder: concat(zm, x) @ W3 == zm @ W3z + x @ W3x (x part already in dx).
    d = jnp.dot(zm, w3z_ref[...], preferred_element_type=jnp.float32) + dx
    d = jnp.maximum(d, 0.0).astype(x.dtype)
    x_hat = jnp.dot(d, w4_ref[...], preferred_element_type=jnp.float32) + b4_ref[...]

    out_ref[...] = x_hat.astype(out_ref.dtype)


# ----------------------------------------------------------------------------
# One-time parameter preparation (padding / casting hoisted out of the call)
# ----------------------------------------------------------------------------
def prepare_params(params):
    D, H = params["w1"].shape
    Z = params["w2"].shape[1]
    Hp, Zp = _round_up(H, LANE), _round_up(Z, LANE)

    # Each half of w13 is individually padded to Hp lanes so the in-kernel
    # split lands on a 128-lane boundary. Padded lanes are exact zeros (zero
    # weight cols + zero bias) so they stay zero through ReLU and contribute
    # nothing to downstream matmuls (padded weight rows are also zero).
    w1 = _pad2(params["w1"], D, Hp, jnp.bfloat16)
    w3x = _pad2(params["w3x"], D, Hp, jnp.bfloat16)
    b1 = _pad2(params["b1"], 1, Hp, jnp.float32)
    b3 = _pad2(params["b3"], 1, Hp, jnp.float32)

    return {
        "D": D, "Hp": Hp, "Zp": Zp,
        "w13": jnp.concatenate([w1, w3x], axis=1),          # (D, 2*Hp) bf16
        "b13": jnp.concatenate([b1, b3], axis=1),            # (1, 2*Hp) f32
        "w2":  _pad2(params["w2"],  Hp, Zp, jnp.bfloat16),
        "b2":  _pad2(params["b2"],  1,  Zp, jnp.float32),
        "w3z": _pad2(params["w3z"], Zp, Hp, jnp.bfloat16),
        "w4":  _pad2(params["w4"],  Hp, D,  jnp.bfloat16),   # N unpadded (= D)
        "b4":  _pad2(params["b4"],  1,  D,  jnp.float32),
    }


# ----------------------------------------------------------------------------
# Forward wrapper
# ----------------------------------------------------------------------------
def vae_forward(x, prepped, *, tb=None):
    B, D = x.shape
    assert D == prepped["D"]
    Hp, Zp = prepped["Hp"], prepped["Zp"]

    if tb is None:
        Bp0 = _round_up(B, 8)
        # Two batch tiles when large enough (even count keeps both v7x TCs
        # busy); otherwise one grid step (lowest overhead on v5e/v6e).
        tb = Bp0 // 2 if (Bp0 >= 512 and Bp0 % 16 == 0) else Bp0
    Bp = _round_up(B, tb)

    # The ONLY per-call data prep: bf16 cast (+ batch pad if B % tb != 0).
    xb = x.astype(jnp.bfloat16)
    if Bp != B:
        xb = jnp.pad(xb, ((0, Bp - B), (0, 0)))

    batch_map = lambda i: (i, 0)   # x / out tiles walk the batch axis
    const_map = lambda i: (0, 0)   # weights/biases stay VMEM-resident

    in_specs = [
        pl.BlockSpec((tb, D),      batch_map),   # x (unpadded lanes)
        pl.BlockSpec((D, 2 * Hp),  const_map),   # w13
        pl.BlockSpec((1, 2 * Hp),  const_map),   # b13
        pl.BlockSpec((Hp, Zp),     const_map),   # w2
        pl.BlockSpec((1,  Zp),     const_map),   # b2
        pl.BlockSpec((Zp, Hp),     const_map),   # w3z
        pl.BlockSpec((Hp, D),      const_map),   # w4
        pl.BlockSpec((1,  D),      const_map),   # b4
    ]
    out_spec = pl.BlockSpec((tb, D), batch_map)

    flops = 2 * Bp * (D * 2 * Hp + Hp * Zp + Zp * Hp + Hp * D)
    weight_bytes = sum(int(np.prod(prepped[k].shape)) * prepped[k].dtype.itemsize
                       for k in ("w13", "b13", "w2", "b2", "w3z", "w4", "b4"))
    bytes_accessed = Bp * D * (2 + 4) + weight_bytes   # bf16 x + f32 out + weights

    out = pl.pallas_call(
        functools.partial(vae_kernel, hp=Hp),
        out_shape=jax.ShapeDtypeStruct((Bp, D), jnp.float32),
        grid=(Bp // tb,),
        in_specs=in_specs,
        out_specs=out_spec,
        compiler_params=pltpu.CompilerParams(
            dimension_semantics=("parallel",)),   # shard batch tiles across TCs (v7x)
        cost_estimate=pl.CostEstimate(
            flops=flops, transcendentals=0, bytes_accessed=bytes_accessed),
    )(xb, prepped["w13"], prepped["b13"], prepped["w2"], prepped["b2"],
      prepped["w3z"], prepped["w4"], prepped["b4"])

    return out if Bp == B else out[:B]


# ----------------------------------------------------------------------------
# Parameters / reference
# ----------------------------------------------------------------------------
def make_params(key, d_in, hidden, latent):
    ks = jax.random.split(key, 8)
    s = 0.1
    return {
        # encoder: d_in -> hidden -> latent
        "w1": s * jax.random.normal(ks[0], (d_in, hidden), jnp.float32),
        "b1": s * jax.random.normal(ks[1], (1, hidden), jnp.float32),
        "w2": s * jax.random.normal(ks[2], (hidden, latent), jnp.float32),
        "b2": s * jax.random.normal(ks[3], (1, latent), jnp.float32),
        # decoder: (latent + d_in) -> hidden -> d_in (first-layer weight pre-split)
        "w3z": s * jax.random.normal(ks[4], (latent, hidden), jnp.float32),
        "w3x": s * jax.random.normal(ks[5], (d_in, hidden), jnp.float32),
        "b3": s * jax.random.normal(ks[6], (1, hidden), jnp.float32),
        "w4": s * jax.random.normal(ks[7], (hidden, d_in), jnp.float32),
        "b4": jnp.zeros((1, d_in), jnp.float32),
    }


def vae_forward_ref(x, p):
    # Pure-JAX reference doing the same bf16-input / f32-accumulate math.
    bf = jnp.bfloat16
    xb = x.astype(bf)
    h = jnp.dot(xb, p["w1"].astype(bf), preferred_element_type=jnp.float32) + p["b1"]
    h = jnp.maximum(h, 0.0).astype(bf)
    zm = (jnp.dot(h, p["w2"].astype(bf), preferred_element_type=jnp.float32)
          + p["b2"]).astype(bf)
    d = (jnp.dot(zm, p["w3z"].astype(bf), preferred_element_type=jnp.float32)
         + jnp.dot(xb, p["w3x"].astype(bf), preferred_element_type=jnp.float32)
         + p["b3"])
    d = jnp.maximum(d, 0.0).astype(bf)
    return jnp.dot(d, p["w4"].astype(bf), preferred_element_type=jnp.float32) + p["b4"]


if __name__ == "__main__":
    # Batch chosen so the default tiling gives 2 tiles of 256 rows;
    # feature dims match the skeleton-graph VAE's small MLP sizes.
    B, D_IN, HIDDEN, LATENT = 512, 32, 64, 16

    key = jax.random.PRNGKey(0)
    k_x, k_p = jax.random.split(key)
    x = jax.random.normal(k_x, (B, D_IN), jnp.float32)
    params = make_params(k_p, D_IN, HIDDEN, LATENT)

    prepped = prepare_params(params)        # one-time weight padding / casting
    x_hat = vae_forward(x, prepped)
    jax.block_until_ready(x_hat)

    ref = vae_forward_ref(x, params)
    np.testing.assert_allclose(np.asarray(x_hat, dtype=np.float32),
                               np.asarray(ref, dtype=np.float32),
                               rtol=2e-2, atol=2e-2)

    print("KERNEL_OK")
</pallas_src>

<mosaic_0001>
module attributes {stable_mosaic.version = 11 : i64} {
  func.func @vae_kernel(%arg0: i32, %arg1: memref<256x32xbf16, #tpu.memory_space<vmem>>, %arg2: memref<32x256xbf16, #tpu.memory_space<vmem>>, %arg3: memref<1x256xf32, #tpu.memory_space<vmem>>, %arg4: memref<128x128xbf16, #tpu.memory_space<vmem>>, %arg5: memref<1x128xf32, #tpu.memory_space<vmem>>, %arg6: memref<128x128xbf16, #tpu.memory_space<vmem>>, %arg7: memref<128x32xbf16, #tpu.memory_space<vmem>>, %arg8: memref<1x32xf32, #tpu.memory_space<vmem>>, %arg9: memref<256x32xf32, #tpu.memory_space<vmem>>) attributes {dimension_semantics = [#tpu.dimension_semantics<parallel>], iteration_bounds = array<i64: 2>, scalar_prefetch = 0 : i64, scratch_operands = 0 : i64, tpu.core_type = #tpu.core_type<tc>, window_params = [{transform_indices = @transform_0, window_bounds = array<i64: 256, 32>}, {pipeline_mode = #tpu.pipeline_mode<synchronous>, transform_indices = @transform_1, window_bounds = array<i64: 32, 256>}, {pipeline_mode = #tpu.pipeline_mode<synchronous>, transform_indices = @transform_2, window_bounds = array<i64: 1, 256>}, {pipeline_mode = #tpu.pipeline_mode<synchronous>, transform_indices = @transform_3, window_bounds = array<i64: 128, 128>}, {pipeline_mode = #tpu.pipeline_mode<synchronous>, transform_indices = @transform_4, window_bounds = array<i64: 1, 128>}, {pipeline_mode = #tpu.pipeline_mode<synchronous>, transform_indices = @transform_5, window_bounds = array<i64: 128, 128>}, {pipeline_mode = #tpu.pipeline_mode<synchronous>, transform_indices = @transform_6, window_bounds = array<i64: 128, 32>}, {pipeline_mode = #tpu.pipeline_mode<synchronous>, transform_indices = @transform_7, window_bounds = array<i64: 1, 32>}, {transform_indices = @transform_8, window_bounds = array<i64: 256, 32>}]} {
    %c0 = arith.constant 0 : index
    %c0_0 = arith.constant 0 : index
    %0 = vector.load %arg1[%c0, %c0_0] : memref<256x32xbf16, #tpu.memory_space<vmem>>, vector<256x32xbf16>
    %c0_1 = arith.constant 0 : index
    %c0_2 = arith.constant 0 : index
    %1 = vector.load %arg2[%c0_1, %c0_2] : memref<32x256xbf16, #tpu.memory_space<vmem>>, vector<32x256xbf16>
    %cst = arith.constant dense<0.000000e+00> : vector<256x256xf32>
    %2 = tpu.matmul %0, %1, %cst {dimension_numbers = #tpu.dot_dimension_numbers<[1], [0], [0], [1], [0, 0, 1, 1], [], []>} : vector<256x32xbf16>, vector<32x256xbf16>, vector<256x256xf32> -> vector<256x256xf32>
    %c0_3 = arith.constant 0 : index
    %c0_4 = arith.constant 0 : index
    %3 = vector.load %arg3[%c0_3, %c0_4] : memref<1x256xf32, #tpu.memory_space<vmem>>, vector<1x256xf32>
    %4 = vector.broadcast %3 : vector<1x256xf32> to vector<256x256xf32>
    %5 = arith.addf %2, %4 : vector<256x256xf32>
    %6 = vector.extract_strided_slice %5 {offsets = [0, 0], sizes = [256, 128], strides = [1, 1]} : vector<256x256xf32> to vector<256x128xf32>
    %cst_5 = arith.constant 0.000000e+00 : f32
    %7 = vector.broadcast %cst_5 : f32 to vector<256x128xf32>
    %8 = arith.maximumf %6, %7 : vector<256x128xf32>
    %9 = arith.truncf %8 : vector<256x128xf32> to vector<256x128xbf16>
    %10 = vector.extract_strided_slice %5 {offsets = [0, 128], sizes = [256, 128], strides = [1, 1]} : vector<256x256xf32> to vector<256x128xf32>
    %c0_6 = arith.constant 0 : index
    %c0_7 = arith.constant 0 : index
    %11 = vector.load %arg4[%c0_6, %c0_7] : memref<128x128xbf16, #tpu.memory_space<vmem>>, vector<128x128xbf16>
    %cst_8 = arith.constant dense<0.000000e+00> : vector<256x128xf32>
    %12 = tpu.matmul %9, %11, %cst_8 {dimension_numbers = #tpu.dot_dimension_numbers<[1], [0], [0], [1], [0, 0, 1, 1], [], []>} : vector<256x128xbf16>, vector<128x128xbf16>, vector<256x128xf32> -> vector<256x128xf32>
    %c0_9 = arith.constant 0 : index
    %c0_10 = arith.constant 0 : index
    %13 = vector.load %arg5[%c0_9, %c0_10] : memref<1x128xf32, #tpu.memory_space<vmem>>, vector<1x128xf32>
    %14 = vector.broadcast %13 : vector<1x128xf32> to vector<256x128xf32>
    %15 = arith.addf %12, %14 : vector<256x128xf32>
    %16 = arith.truncf %15 : vector<256x128xf32> to vector<256x128xbf16>
    %c0_11 = arith.constant 0 : index
    %c0_12 = arith.constant 0 : index
    %17 = vector.load %arg6[%c0_11, %c0_12] : memref<128x128xbf16, #tpu.memory_space<vmem>>, vector<128x128xbf16>
    %cst_13 = arith.constant dense<0.000000e+00> : vector<256x128xf32>
    %18 = tpu.matmul %16, %17, %cst_13 {dimension_numbers = #tpu.dot_dimension_numbers<[1], [0], [0], [1], [0, 0, 1, 1], [], []>} : vector<256x128xbf16>, vector<128x128xbf16>, vector<256x128xf32> -> vector<256x128xf32>
    %19 = arith.addf %18, %10 : vector<256x128xf32>
    %cst_14 = arith.constant 0.000000e+00 : f32
    %20 = vector.broadcast %cst_14 : f32 to vector<256x128xf32>
    %21 = arith.maximumf %19, %20 : vector<256x128xf32>
    %22 = arith.truncf %21 : vector<256x128xf32> to vector<256x128xbf16>
    %c0_15 = arith.constant 0 : index
    %c0_16 = arith.constant 0 : index
    %23 = vector.load %arg7[%c0_15, %c0_16] : memref<128x32xbf16, #tpu.memory_space<vmem>>, vector<128x32xbf16>
    %cst_17 = arith.constant dense<0.000000e+00> : vector<256x32xf32>
    %24 = tpu.matmul %22, %23, %cst_17 {dimension_numbers = #tpu.dot_dimension_numbers<[1], [0], [0], [1], [0, 0, 1, 1], [], []>} : vector<256x128xbf16>, vector<128x32xbf16>, vector<256x32xf32> -> vector<256x32xf32>
    %c0_18 = arith.constant 0 : index
    %c0_19 = arith.constant 0 : index
    %25 = vector.load %arg8[%c0_18, %c0_19] : memref<1x32xf32, #tpu.memory_space<vmem>>, vector<1x32xf32>
    %26 = vector.broadcast %25 : vector<1x32xf32> to vector<256x32xf32>
    %27 = arith.addf %24, %26 : vector<256x32xf32>
    %c0_20 = arith.constant 0 : index
    %c0_21 = arith.constant 0 : index
    %28 = vector.load %arg9[%c0_20, %c0_21] : memref<256x32xf32, #tpu.memory_space<vmem>>, vector<256x32xf32>
    tpu.vector_store %arg9[%c0_20, %c0_21], %27 {strides = array<i32>} : memref<256x32xf32, #tpu.memory_space<vmem>>, vector<256x32xf32>,
    return
  }
  func.func @transform_0(%arg0: i32) -> (i32, i32) {
    %c0_i32 = arith.constant 0 : i32
    %c0_i32_0 = arith.constant 0 : i32
    return %arg0, %c0_i32 : i32, i32
  }
  func.func @transform_1(%arg0: i32) -> (i32, i32) {
    %c0_i32 = arith.constant 0 : i32
    %c0_i32_0 = arith.constant 0 : i32
    %c0_i32_1 = arith.constant 0 : i32
    return %c0_i32, %c0_i32_0 : i32, i32
  }
  func.func @transform_2(%arg0: i32) -> (i32, i32) {
    %c0_i32 = arith.constant 0 : i32
    %c0_i32_0 = arith.constant 0 : i32
    %c0_i32_1 = arith.constant 0 : i32
    return %c0_i32, %c0_i32_0 : i32, i32
  }
  func.func @transform_3(%arg0: i32) -> (i32, i32) {
    %c0_i32 = arith.constant 0 : i32
    %c0_i32_0 = arith.constant 0 : i32
    %c0_i32_1 = arith.constant 0 : i32
    return %c0_i32, %c0_i32_0 : i32, i32
  }
  func.func @transform_4(%arg0: i32) -> (i32, i32) {
    %c0_i32 = arith.constant 0 : i32
    %c0_i32_0 = arith.constant 0 : i32
    %c0_i32_1 = arith.constant 0 : i32
    return %c0_i32, %c0_i32_0 : i32, i32
  }
  func.func @transform_5(%arg0: i32) -> (i32, i32) {
    %c0_i32 = arith.constant 0 : i32
    %c0_i32_0 = arith.constant 0 : i32
    %c0_i32_1 = arith.constant 0 : i32
    return %c0_i32, %c0_i32_0 : i32, i32
  }
  func.func @transform_6(%arg0: i32) -> (i32, i32) {
    %c0_i32 = arith.constant 0 : i32
    %c0_i32_0 = arith.constant 0 : i32
    %c0_i32_1 = arith.constant 0 : i32
    return %c0_i32, %c0_i32_0 : i32, i32
  }
  func.func @transform_7(%arg0: i32) -> (i32, i32) {
    %c0_i32 = arith.constant 0 : i32
    %c0_i32_0 = arith.constant 0 : i32
    %c0_i32_1 = arith.constant 0 : i32
    return %c0_i32, %c0_i32_0 : i32, i32
  }
  func.func @transform_8(%arg0: i32) -> (i32, i32) {
    %c0_i32 = arith.constant 0 : i32
    %c0_i32_0 = arith.constant 0 : i32
    return %arg0, %c0_i32 : i32, i32
  }
}

</mosaic_0001>

<bundles_post_ra>
// kernel: tpu_custom_call.1
= control target key start
LH: loop header
LB: loop body
LE: loop exit
PB: predicated region body
PF: predicated region fallthrough
CT: control target
= control target key end

     0   :  { %s1991_s27 = smov 0   ;;  %s2461_s0 = inlined_call_operand.vmem [shape: bf16[512,32], index: 0, kind: input, shape index: {}]   ;;  %s2462_s1 = inlined_call_operand.vmem [shape: bf16[32,256], index: 1, kind: input, shape index: {}]   ;;  %s2463_s2 = inlined_call_operand.vmem [shape: f32[1,256], index: 2, kind: input, shape index: {}]   ;;  %s2464_s3 = inlined_call_operand.vmem [shape: bf16[128,128], index: 3, kind: input, shape index: {}]   ;;  %s2465_s4 = inlined_call_operand.vmem [shape: f32[1,128], index: 4, kind: input, shape index: {}]   ;;  %s2466_s5 = inlined_call_operand.vmem [shape: bf16[128,128], index: 5, kind: input, shape index: {}]   ;;  %s2467_s6 = inlined_call_operand.vmem [shape: bf16[128,32], index: 6, kind: input, shape index: {}]   ;;  %s2468_s7 = inlined_call_operand.vmem [shape: f32[1,32], index: 7, kind: input, shape index: {}]   ;;  %s2469_s8 = inlined_call_operand.vmem [shape: f32[512,32], index: 8, kind: output, shape index: {}]  }
   0x1 LB: > { %s1589_s28 = sadd.s32 4294967295, %s1943_s27   ;;  %p1593_p0 = scmp.ge.s32.totalorder %s1943_s27, 1  ;;  %s1943_s27 = sphi %s1991_s27, %s18_s27  }
   0x2   : > { %p263_p1 = scmp.lt.s32.totalorder %s1943_s27, 3 }
   0x4   : > { %p264_p2 = pnand %p1593_p0, %p263_p1 }
   0x5   : > { %s1594_s9 = sshll.u32 (!%p264_p2), %s1589_s28, 5 }
   0x6   : > { %267 = sbr.rel (%p264_p2) target bundleno = 940 (0x3ac), region = 52  ;;  %p298_p3 = scmp.lt.s32.totalorder (!%p264_p2), %s1594_s9, 63 }
   0xb   : > { %v1891_v0 = vld [vmem:[%s2462_s1 + $0x14] ss:$8 sps:$4 sm:$0xff]   ;;  %v1893_v1 = vld [vmem:[%s2462_s1 + $0x10] ss:$8 sps:$4 sm:$0xff]   ;;  %v1945_v2 = vmov 0   ;;  %s2471_s9 = smov (!%p298_p3, %s1594_s9), 63  ;;  %v348_v29 = vlaneseq }
   0xc   : > { %539 = vmatprep.mubr.bf16.mxu0 %v1945_v2  ;;  %659 = vmatprep.mubr.bf16.mxu1 %v1945_v2  ;;  %v1894_v3 = vld [vmem:[%s2462_s1 + $0x4] ss:$8 sps:$4 sm:$0xff]   ;;  %v1896_v4 = vld [vmem:[%s2462_s1] ss:$8 sps:$4 sm:$0xff]   ;;  %v1913_v5 = vld [vmem:[%s2464_s3 + $0x38] sm:$0xff]   ;;  %s1595_s18 = sshll.u32 %s2471_s9, 2 }
   0xd   : > { %519 = vmatprep.subr.bf16.mxu0 %v1891_v0  ;;  %1878 = vmatprep.subr.bf16.mxu1 %v1891_v0  ;;  %s2022_s21 = scalar_lea.vmem %s2461_s0, %s1595_s18  ;;  %vm458_vm0 = vcmask 261120   ;;  %v1914_v8 = vld [vmem:[%s2464_s3 + $0x30] sm:$0xff]   ;;  %v1915_v10 = vld [vmem:[%s2464_s3 + $0x28] sm:$0xff]   ;;  %v1916_v13 = vld [vmem:[%s2464_s3 + $0x20] sm:$0xff]   ;;  %v2094_v31 = vshrl.u32 %v348_v29, 7  ;;  %s1597_s12 = sshll.u32 %s2471_s9, 3 }
   0xe   : > { %520 = vmatpush1.bf16.msra.mxu0 %v1893_v1  ;;  %1880 = vmatpush1.bf16.msra.mxu1 %v1893_v1  ;;  %v1897_v6 = vld [vmem:[%s2022_s21] sm:$0xff]   ;;  %v1898_v7 = vld [vmem:[%s2022_s21 + $0x8] sm:$0xff]   ;;  %v1899_v11 = vld [vmem:[%s2022_s21 + $0x10] sm:$0xff]   ;;  %s2360_s17 = scalar_lea.vmem %s2469_s8, %s1597_s12 }
   0xf   : > { %521 = vmatprep.subr.bf16.mxu0 %v1894_v3  ;;  %1879 = vmatprep.subr.bf16.mxu1 %v1894_v3  ;;  %v1907_v9 = vld [vmem:[%s2022_s21 + $0x60] sm:$0xff]   ;;  %v1909_v12 = vld [vmem:[%s2022_s21 + $0x68] sm:$0xff]   ;;  %v1900_v14 = vld [vmem:[%s2022_s21 + $0x18] sm:$0xff]   ;;  %v350_v32 = vsub.s32 0, %v2094_v31 }
  0x10   : > { %v1911_v15 = vld [vmem:[%s2022_s21 + $0x70] sm:$0xff]   ;;  %v1901_v16 = vld [vmem:[%s2022_s21 + $0x20] sm:$0xff]   ;;  %v1912_v17 = vld [vmem:[%s2022_s21 + $0x78] sm:$0xff]  }
  0x11   : > { %v1902_v18 = vld [vmem:[%s2022_s21 + $0x28] sm:$0xff]   ;;  %v1903_v19 = vld [vmem:[%s2022_s21 + $0x30] sm:$0xff]   ;;  %v1904_v20 = vld [vmem:[%s2022_s21 + $0x38] sm:$0xff]  }
  0x12   : > { %522 = vmatpush1.bf16.msra.mxu0 %v1896_v4  ;;  %1881 = vmatpush1.bf16.msra.mxu1 %v1896_v4  ;;  %v1905_v21 = vld [vmem:[%s2022_s21 + $0x40] sm:$0xff]   ;;  %v1917_v22 = vld [vmem:[%s2464_s3 + $0x18] sm:$0xff]   ;;  %v1906_v23 = vld [vmem:[%s2022_s21 + $0x48] sm:$0xff]  }
  0x13   : > { %1734 = vmatprep.subr.bf16.mxu1 %v1913_v5  ;;  %v1918_v24 = vld [vmem:[%s2464_s3 + $0x10] sm:$0xff]   ;;  %v1919_v25 = vld [vmem:[%s2464_s3 + $0x8] sm:$0xff]   ;;  %v1920_v27 = vld [vmem:[%s2464_s3] sm:$0xff]  }
  0x14   : > { %v1908_v26 = vld [vmem:[%s2022_s21 + $0x50] sm:$0xff]   ;;  %v1910_v28 = vld [vmem:[%s2022_s21 + $0x58] sm:$0xff]   ;;  %v2100_v33 = vld [vmem:[%s2463_s2] sm:$0x3] }
  0x15   : > { %1618 = vmatmul.mubr.msk.bf16.vlgmr.msra.gmra.mxu0 %vm458_vm0, %v1897_v6  ;;  %1630 = vmatmul.mubr.msk.bf16.vlgmr.msra.gmra.mxu1 %vm458_vm0, %v1907_v9  ;;  %v1921_v30 = vld [vmem:[%s2466_s5 + $0x38] sm:$0xff]   ;;  %v2103_v34 = vrot.slane %v2100_v33, %v350_v32  ;;  %v1922_v54 = vld [vmem:[%s2466_s5 + $0x30] sm:$0xff]   ;;  %v1923_v59 = vld [vmem:[%s2466_s5 + $0x28] sm:$0xff]  }
  0x16   : > { %549 = vmatprep.mubr.bf16.mxu0 %v1945_v2  ;;  %669 = vmatprep.mubr.bf16.mxu1 %v1945_v2  ;;  %v1924_v1 = vld [vmem:[%s2466_s5 + $0x20] sm:$0xff]   ;;  %v1925_v6 = vld [vmem:[%s2466_s5 + $0x18] sm:$0xff]  }
  0x17   : > { %1735 = vmatpush3.bf16.msra.mxu1 %v1913_v5 }
  0x18   : > { %1736 = vmatprep.subr.bf16.mxu1 %v1914_v8 }
  0x1b   : > { %1737 = vmatpush3.bf16.msra.mxu1 %v1914_v8 }
  0x1c   : > { %1738 = vmatprep.subr.bf16.mxu1 %v1915_v10 }
  0x1d   : > { %1619 = vmatmul.mubr.msk.bf16.gmra.mxu0 %vm458_vm0, %v1898_v7  ;;  %1631 = vmatmul.mubr.msk.bf16.gmra.mxu1 %vm458_vm0, %v1909_v12 }
  0x1e   : > { %559 = vmatprep.mubr.bf16.mxu0 %v1945_v2  ;;  %679 = vmatprep.mubr.bf16.mxu1 %v1945_v2 }
  0x1f   : > { %1739 = vmatpush3.bf16.msra.mxu1 %v1915_v10 }
  0x20   : > { %1740 = vmatprep.subr.bf16.mxu1 %v1916_v13 }
  0x23   : > { %1741 = vmatpush3.bf16.msra.mxu1 %v1916_v13 }
  0x24   : > { %1742 = vmatprep.subr.bf16.mxu1 %v1917_v22 }
  0x25   : > { %1620 = vmatmul.mubr.msk.bf16.gmra.mxu0 %vm458_vm0, %v1899_v11  ;;  %1632 = vmatmul.mubr.msk.bf16.gmra.mxu1 %vm458_vm0, %v1911_v15 }
  0x26   : > { %569 = vmatprep.mubr.bf16.mxu0 %v1945_v2  ;;  %689 = vmatprep.mubr.bf16.mxu1 %v1945_v2 }
  0x27   : > { %1743 = vmatpush3.bf16.msra.mxu1 %v1917_v22 }
  0x28   : > { %1744 = vmatprep.subr.bf16.mxu1 %v1918_v24 }
  0x2b   : > { %1745 = vmatpush3.bf16.msra.mxu1 %v1918_v24 }
  0x2c   : > { %1746 = vmatprep.subr.bf16.mxu1 %v1919_v25 }
  0x2d   : > { %1621 = vmatmul.mubr.msk.bf16.gmra.mxu0 %vm458_vm0, %v1900_v14  ;;  %1633 = vmatmul.mubr.msk.bf16.gmra.mxu1 %vm458_vm0, %v1912_v17 }
  0x2e   : > { %579 = vmatprep.mubr.bf16.mxu0 %v1945_v2 }
  0x2f   : > { %1747 = vmatpush3.bf16.msra.mxu1 %v1919_v25 }
  0x30   : > { %1748 = vmatprep.subr.bf16.mxu1 %v1920_v27 }
  0x33   : > { %1749 = vmatpush3.bf16.msra.mxu1 %v1920_v27 }
  0x34   : > { %1782 = vmatprep.subr.bf16.mxu1 %v1921_v30 }
  0x35   : > { %1622 = vmatmul.mubr.msk.bf16.gmra.mxu0 %vm458_vm0, %v1901_v16 }
  0x36   : > { %589 = vmatprep.mubr.bf16.mxu0 %v1945_v2 }
  0x3d   : > { %1623 = vmatmul.mubr.msk.bf16.gmra.mxu0 %vm458_vm0, %v1902_v18 }
  0x3e   : > { %599 = vmatprep.mubr.bf16.mxu0 %v1945_v2 }
  0x45   : > { %1624 = vmatmul.mubr.msk.bf16.gmra.mxu0 %vm458_vm0, %v1903_v19 }
  0x46   : > { %609 = vmatprep.mubr.bf16.mxu0 %v1945_v2 }
  0x4d   : > { %1625 = vmatmul.mubr.msk.bf16.gmra.mxu0 %vm458_vm0, %v1904_v20 }
  0x4e   : > { %619 = vmatprep.mubr.bf16.mxu0 %v1945_v2 }
  0x55   : > { %1626 = vmatmul.mubr.msk.bf16.gmra.mxu0 %vm458_vm0, %v1905_v21 }
  0x56   : > { %629 = vmatprep.mubr.bf16.mxu0 %v1945_v2 }
  0x5d   : > { %1627 = vmatmul.mubr.msk.bf16.gmra.mxu0 %vm458_vm0, %v1906_v23 }
  0x5e   : > { %639 = vmatprep.mubr.bf16.mxu0 %v1945_v2 }
  0x65   : > { %1628 = vmatmul.mubr.msk.bf16.gmra.mxu0 %vm458_vm0, %v1908_v26 }
  0x66   : > { %649 = vmatprep.mubr.bf16.mxu0 %v1945_v2 }
  0x6d   : > { %1629 = vmatmul.mubr.msk.bf16.gmra.mxu0 %vm458_vm0, %v1910_v28 }
  0xd5   : > { %v541_v35 = vpop.f32.mrf.mxu0  ;;  %v2153_v29 = vpop.f32.mrf.mxu1 }
  0xd6   : > { %v542_v37 = vadd.f32 %v541_v35, %v2103_v34 }
  0xd7   : > { %v2105_v36 = vpop.f32.mrf.mxu0 }
  0xd8   : > { %v700_v41 = vmax.f32 %v542_v37, 0.0 }
  0xd9   : > { %v545_v38 = vpop.f32.mrf.mxu0 }
  0xda   : > { %v546_v39 = vadd.f32 %v545_v38, %v2103_v34  ;;  %v2158_v38 = vpop.f32.mrf.mxu1 }
  0xdb   : > { %v2109_v40 = vpop.f32.mrf.mxu0 }
  0xdc   : > { %v701_v42 = vmax.f32 %v546_v39, 0.0 }
  0xdd   : > { %v551_v43 = vpop.f32.mrf.mxu0 }
  0xde   : > { %v732_v44 = vpack.c.bf16 %v701_v42, %v700_v41  ;;  %v552_v46 = vadd.f32 %v551_v43, %v2103_v34 }
  0xdf   : > { %v2111_v45 = vpop.f32.mrf.mxu0 }
  0xe0   : > { %1750 = vmatprep.mubr.bf16.mxu1 %v732_v44  ;;  %v702_v50 = vmax.f32 %v552_v46, 0.0  ;;  %v665_v46 = vpop.f32.mrf.mxu1 }
  0xe1   : > { %v555_v47 = vpop.f32.mrf.mxu0 }
  0xe2   : > { %v556_v48 = vadd.f32 %v555_v47, %v2103_v34 }
  0xe3   : > { %v2115_v49 = vpop.f32.mrf.mxu0 }
  0xe4   : > { %v703_v51 = vmax.f32 %v556_v48, 0.0 }
  0xe5   : > { %v561_v52 = vpop.f32.mrf.mxu0 }
  0xe6   : > { %v733_v53 = vpack.c.bf16 %v703_v51, %v702_v50  ;;  %v562_v56 = vadd.f32 %v561_v52, %v2103_v34  ;;  %v2166_v52 = vpop.f32.mrf.mxu1 }
  0xe7   : > { %v2120_v55 = vpop.f32.mrf.mxu0 }
  0xe8   : > { %1751 = vmatmul.mubr.bf16.vlgmr.msra.gmra.mxu1 %v733_v53  ;;  %v704_v61 = vmax.f32 %v562_v56, 0.0 }
  0xe9   : > { %v565_v57 = vpop.f32.mrf.mxu0  ;;  %1783 = vmatpush3.bf16.msra.mxu1 %v1921_v30 }
  0xea   : > { %v566_v58 = vadd.f32 %v565_v57, %v2103_v34  ;;  %1784 = vmatprep.subr.bf16.mxu1 %v1922_v54 }
  0xeb   : > { %v2127_v60 = vpop.f32.mrf.mxu0 }
  0xec   : > { %v705_v62 = vmax.f32 %v566_v58, 0.0 }
  0xed   : > { %v571_v63 = vpop.f32.mrf.mxu0  ;;  %1785 = vmatpush3.bf16.msra.mxu1 %v1922_v54 }
  0xee   : > { %v734_v0 = vpack.c.bf16 %v705_v62, %v704_v61  ;;  %1786 = vmatprep.subr.bf16.mxu1 %v1923_v59  ;;  %v572_v3 = vadd.f32 %v571_v63, %v2103_v34 }
  0xef   : > { %v2132_v2 = vpop.f32.mrf.mxu0 }
  0xf0   : > { %1754 = vmatprep.mubr.bf16.mxu1 %v734_v0  ;;  %v706_v8 = vmax.f32 %v572_v3, 0.0 }
  0xf1   : > { %v575_v4 = vpop.f32.mrf.mxu0  ;;  %1787 = vmatpush3.bf16.msra.mxu1 %v1923_v59  ;;  %v671_v59 = vpop.f32.mrf.mxu1 }
  0xf2   : > { %v576_v5 = vadd.f32 %v575_v4, %v2103_v34  ;;  %1788 = vmatprep.subr.bf16.mxu1 %v1924_v1 }
  0xf3   : > { %v2139_v7 = vpop.f32.mrf.mxu0 }
  0xf4   : > { %v707_v9 = vmax.f32 %v576_v5, 0.0 }
  0xf5   : > { %v581_v10 = vpop.f32.mrf.mxu0  ;;  %1789 = vmatpush3.bf16.msra.mxu1 %v1924_v1  ;;  %v2174_v1 = vpop.f32.mrf.mxu1 }
  0xf6   : > { %v735_v11 = vpack.c.bf16 %v707_v9, %v706_v8  ;;  %1790 = vmatprep.subr.bf16.mxu1 %v1925_v6  ;;  %v582_v13 = vadd.f32 %v581_v10, %v2103_v34 }
  0xf7   : > { %v2141_v12 = vpop.f32.mrf.mxu0  ;;  %v675_v9 = vpop.f32.mrf.mxu1 }
  0xf8   : > { %1755 = vmatmul.mubr.bf16.gmra.mxu1 %v735_v11  ;;  %v708_v17 = vmax.f32 %v582_v13, 0.0 }
  0xf9   : > { %v585_v14 = vpop.f32.mrf.mxu0  ;;  %1791 = vmatpush3.bf16.msra.mxu1 %v1925_v6 }
  0xfa   : > { %v586_v15 = vadd.f32 %v585_v14, %v2103_v34 }
  0xfb   : > { %v2145_v16 = vpop.f32.mrf.mxu0 }
  0xfc   : > { %v709_v18 = vmax.f32 %v586_v15, 0.0  ;;  %v2182_v15 = vpop.f32.mrf.mxu1 }
  0xfd   : > { %v591_v19 = vpop.f32.mrf.mxu0 }
  0xfe   : > { %v736_v20 = vpack.c.bf16 %v709_v18, %v708_v17  ;;  %v592_v22 = vadd.f32 %v591_v19, %v2103_v34 }
  0xff   : > { %v2147_v21 = vpop.f32.mrf.mxu0 }
 0x100   : > { %1758 = vmatprep.mubr.bf16.mxu1 %v736_v20  ;;  %v710_v26 = vmax.f32 %v592_v22, 0.0 }
 0x101   : > { %v595_v23 = vpop.f32.mrf.mxu0 }
 0x102   : > { %v596_v24 = vadd.f32 %v595_v23, %v2103_v34  ;;  %v681_v23 = vpop.f32.mrf.mxu1 }
 0x103   : > { %v2151_v25 = vpop.f32.mrf.mxu0 }
 0x104   : > { %v711_v27 = vmax.f32 %v596_v24, 0.0 }
 0x105   : > { %v601_v28 = vpop.f32.mrf.mxu0 }
 0x106   : > { %v737_v30 = vpack.c.bf16 %v711_v27, %v710_v26  ;;  %v602_v35 = vadd.f32 %v601_v28, %v2103_v34  ;;  %v1926_v26 = vld [vmem:[%s2466_s5 + $0x10] sm:$0xff]  }
 0x107   : > { %v2155_v32 = vpop.f32.mrf.mxu0  ;;  %1792 = vmatprep.subr.bf16.mxu1 %v1926_v26 }
 0x108   : > { %1759 = vmatmul.mubr.bf16.gmra.mxu1 %v737_v30  ;;  %v712_v42 = vmax.f32 %v602_v35, 0.0  ;;  %v2193_v35 = vpop.f32.mrf.mxu1 }
 0x109   : > { %v605_v37 = vpop.f32.mrf.mxu0  ;;  %1793 = vmatpush3.bf16.msra.mxu1 %v1926_v26 }
 0x10a   : > { %v606_v39 = vadd.f32 %v605_v37, %v2103_v34 }
 0x10b   : > { %v2161_v41 = vpop.f32.mrf.mxu0 }
 0x10c   : > { %v713_v43 = vmax.f32 %v606_v39, 0.0  ;;  %v1927_v39 = vld [vmem:[%s2466_s5 + $0x8] sm:$0xff]  }
 0x10d   : > { %v611_v44 = vpop.f32.mrf.mxu0  ;;  %1794 = vmatprep.subr.bf16.mxu1 %v1927_v39 }
 0x10e   : > { %v738_v47 = vpack.c.bf16 %v713_v43, %v712_v42  ;;  %v612_v50 = vadd.f32 %v611_v44, %v2103_v34  ;;  %1795 = vmatpush3.bf16.msra.mxu1 %v1927_v39 }
 0x10f   : > { %v2163_v48 = vpop.f32.mrf.mxu0 }
 0x110   : > { %1762 = vmatprep.mubr.bf16.mxu1 %v738_v47  ;;  %v714_v56 = vmax.f32 %v612_v50, 0.0  ;;  %v685_v50 = vpop.f32.mrf.mxu1 }
 0x111   : > { %v615_v51 = vpop.f32.mrf.mxu0 }
 0x112   : > { %v616_v53 = vadd.f32 %v615_v51, %v2103_v34 }
 0x113   : > { %v2169_v54 = vpop.f32.mrf.mxu0 }
 0x114   : > { %v715_v57 = vmax.f32 %v616_v53, 0.0  ;;  %v1928_v53 = vld [vmem:[%s2466_s5] sm:$0xff]  }
 0x115   : > { %v621_v58 = vpop.f32.mrf.mxu0  ;;  %1796 = vmatprep.subr.bf16.mxu1 %v1928_v53 }
 0x116   : > { %v739_v61 = vpack.c.bf16 %v715_v57, %v714_v56  ;;  %v622_v63 = vadd.f32 %v621_v58, %v2103_v34  ;;  %v662_v56 = vadd.f32 %v2153_v29, %v2103_v34  ;;  %v666_v57 = vadd.f32 %v665_v46, %v2103_v34  ;;  %1797 = vmatpush3.bf16.msra.mxu1 %v1928_v53  ;;  %v1932_v53 = vld [vmem:[%s2467_s6 + $0x20] sm:$0xff]  }
 0x117   : > { %v2171_v62 = vpop.f32.mrf.mxu0  ;;  %v672_v29 = vadd.f32 %v671_v59, %v2103_v34  ;;  %v676_v46 = vadd.f32 %v675_v9, %v2103_v34 }
 0x118   : > { %1763 = vmatmul.mubr.bf16.gmra.mxu1 %v739_v61  ;;  %v716_v5 = vmax.f32 %v622_v63, 0.0 }
 0x119   : > { %v625_v0 = vpop.f32.mrf.mxu0  ;;  %v727_v26 = vmax.f32 %v676_v46, 0.0 }
 0x11a   : > { %v626_v3 = vadd.f32 %v625_v0, %v2103_v34  ;;  %v2210_v0 = vpop.f32.mrf.mxu1 }
 0x11b   : > { %v2177_v4 = vpop.f32.mrf.mxu0 }
 0x11c   : > { %v717_v6 = vmax.f32 %v626_v3, 0.0 }
 0x11d   : > { %v631_v8 = vpop.f32.mrf.mxu0 }
 0x11e   : > { %v740_v10 = vpack.c.bf16 %v717_v6, %v716_v5  ;;  %v632_v13 = vadd.f32 %v631_v8, %v2103_v34  ;;  %v724_v5 = vmax.f32 %v662_v56, 0.0  ;;  %v725_v6 = vmax.f32 %v666_v57, 0.0  ;;  %v1933_v56 = vld [vmem:[%s2467_s6 + $0x18] sm:$0xff]  }
 0x11f   : > { %v2179_v11 = vpop.f32.mrf.mxu0 }
 0x120   : > { %1766 = vmatprep.mubr.bf16.mxu1 %v740_v10  ;;  %v718_v19 = vmax.f32 %v632_v13, 0.0  ;;  %v691_v13 = vpop.f32.mrf.mxu1 }
 0x121   : > { %v635_v14 = vpop.f32.mrf.mxu0  ;;  %v692_v59 = vadd.f32 %v691_v13, %v2103_v34 }
 0x122   : > { %v636_v17 = vadd.f32 %v635_v14, %v2103_v34 }
 0x123   : > { %v2185_v18 = vpop.f32.mrf.mxu0 }
 0x124   : > { %v719_v20 = vmax.f32 %v636_v17, 0.0  ;;  %v744_v17 = vpack.c.bf16 %v725_v6, %v724_v5  ;;  %v2241_v5 = vld [vmem:[%s2465_s4] ss:$0 sm:$0xff] }
 0x125   : > { %v641_v22 = vpop.f32.mrf.mxu0 }
 0x126   : > { %v741_v24 = vpack.c.bf16 %v719_v20, %v718_v19  ;;  %v642_v28 = vadd.f32 %v641_v22, %v2103_v34  ;;  %v682_v19 = vadd.f32 %v681_v23, %v2103_v34  ;;  %v686_v20 = vadd.f32 %v685_v50, %v2103_v34  ;;  %v2217_v22 = vpop.f32.mrf.mxu1  ;;  %v1929_v50 = vld [vmem:[%s2467_s6 + $0x38] sm:$0xff]  }
 0x127   : > { %v2190_v27 = vpop.f32.mrf.mxu0  ;;  %v730_v23 = vmax.f32 %v692_v59, 0.0  ;;  %1830 = vmatprep.subr.bf16.mxu0 %v1929_v50 }
 0x128   : > { %1767 = vmatmul.mubr.bf16.gmra.mxu1 %v741_v24  ;;  %v720_v43 = vmax.f32 %v642_v28, 0.0  ;;  %v726_v24 = vmax.f32 %v672_v29, 0.0  ;;  %v728_v28 = vmax.f32 %v682_v19, 0.0  ;;  %1831 = vmatpush3.bf16.msra.mxu0 %v1929_v50 }
 0x129   : > { %v645_v30 = vpop.f32.mrf.mxu0 }
 0x12a   : > { %v646_v37 = vadd.f32 %v645_v30, %v2103_v34  ;;  %v729_v30 = vmax.f32 %v686_v20, 0.0  ;;  %v745_v39 = vpack.c.bf16 %v727_v26, %v726_v24 }
 0x12b   : > { %v2199_v42 = vpop.f32.mrf.mxu0 }
 0x12c   : > { %v721_v44 = vmax.f32 %v646_v37, 0.0  ;;  %v695_v37 = vpop.f32.mrf.mxu1 }
 0x12d   : > { %v651_v47 = vpop.f32.mrf.mxu0  ;;  %v696_v9 = vadd.f32 %v695_v37, %v2103_v34 }
 0x12e   : > { %v742_v51 = vpack.c.bf16 %v721_v44, %v720_v43  ;;  %v652_v61 = vadd.f32 %v651_v47, %v2103_v34  ;;  %v746_v43 = vpack.c.bf16 %v729_v30, %v728_v28  ;;  %v2236_v57 = vpop.f32.mrf.mxu1 }
 0x12f   : > { %v2207_v58 = vpop.f32.mrf.mxu0  ;;  %v731_v44 = vmax.f32 %v696_v9, 0.0 }
 0x130   : > { %1770 = vmatprep.mubr.bf16.mxu1 %v742_v51  ;;  %v722_v8 = vmax.f32 %v652_v61, 0.0  ;;  %v1930_v51 = vld [vmem:[%s2467_s6 + $0x30] sm:$0xff]  }
 0x131   : > { %v655_v63 = vpop.f32.mrf.mxu0  ;;  %v747_v47 = vpack.c.bf16 %v731_v44, %v730_v23  ;;  %1832 = vmatprep.subr.bf16.mxu0 %v1930_v51 }
 0x132   : > { %v656_v3 = vadd.f32 %v655_v63, %v2103_v34  ;;  %v1931_v34 = vld [vmem:[%s2467_s6 + $0x28] sm:$0xff]   ;;  %1833 = vmatpush3.bf16.msra.mxu0 %v1930_v51 }
 0x133   : > { %1834 = vmatprep.subr.bf16.mxu0 %v1931_v34 }
 0x134   : > { %v723_v10 = vmax.f32 %v656_v3, 0.0 }
 0x136   : > { %v743_v14 = vpack.c.bf16 %v723_v10, %v722_v8  ;;  %1835 = vmatpush3.bf16.msra.mxu0 %v1931_v34 }
 0x137   : > { %1836 = vmatprep.subr.bf16.mxu0 %v1932_v53 }
 0x138   : > { %1771 = vmatmul.mubr.bf16.gmra.mxu1 %v743_v14 }
 0x139   : > { %1774 = vmatprep.mubr.bf16.mxu1 %v744_v17 }
 0x13a   : > { %1837 = vmatpush3.bf16.msra.mxu0 %v1932_v53 }
 0x13b   : > { %1838 = vmatprep.subr.bf16.mxu0 %v1933_v56 }
 0x13e   : > { %1839 = vmatpush3.bf16.msra.mxu0 %v1933_v56 }
 0x140   : > { %1775 = vmatmul.mubr.bf16.gmra.mxu1 %v745_v39 }
 0x141   : > { %1778 = vmatprep.mubr.bf16.mxu1 %v746_v43 }
 0x148   : > { %1779 = vmatmul.mubr.bf16.gmra.mxu1 %v747_v47 }
 0x1a8   : > { %v1752_v61 = vpop.f32.mrf.mxu1 }
 0x1a9   : > { %v862_v29 = vadd.f32 %v1752_v61, %v2241_v5 }
 0x1aa   : > { %v853_v63 = vpop.f32.mrf.mxu1 }
 0x1ab   : > { %v854_v10 = vadd.f32 %v2241_v5, %v853_v63 }
 0x1ac   : > { %v1753_v3 = vpop.f32.mrf.mxu1 }
 0x1ad   : > { %v865_v6 = vadd.f32 %v1753_v3, %v2241_v5 }
 0x1ae   : > { %v856_v8 = vpop.f32.mrf.mxu1 }
 0x1af   : > { %v857_v13 = vadd.f32 %v2241_v5, %v856_v8  ;;  %v981_v14 = vpack.c.bf16 %v865_v6, %v862_v29 }
 0x1b1   : > { %v980_v46 = vpack.c.bf16 %v857_v13, %v854_v10 }
 0x1b3   : > { %1798 = vmatprep.mubr.bf16.mxu1 %v980_v46 }
 0x1b4   : > { %1799 = vmatmul.mubr.bf16.vlgmr.msra.gmra.mxu1 %v981_v14 }
 0x1b8   : > { %v1756_v17 = vpop.f32.mrf.mxu1 }
 0x1b9   : > { %v878_v37 = vadd.f32 %v1756_v17, %v2241_v5 }
 0x1ba   : > { %v869_v19 = vpop.f32.mrf.mxu1 }
 0x1bb   : > { %v870_v28 = vadd.f32 %v2241_v5, %v869_v19 }
 0x1bc   : > { %v1757_v20 = vpop.f32.mrf.mxu1 }
 0x1bd   : > { %v881_v24 = vadd.f32 %v1757_v20, %v2241_v5 }
 0x1be   : > { %v872_v26 = vpop.f32.mrf.mxu1 }
 0x1bf   : > { %v873_v30 = vadd.f32 %v2241_v5, %v872_v26  ;;  %v983_v59 = vpack.c.bf16 %v881_v24, %v878_v37 }
 0x1c1   : > { %v982_v39 = vpack.c.bf16 %v873_v30, %v870_v28 }
 0x1c3   : > { %1802 = vmatprep.mubr.bf16.mxu1 %v982_v39 }
 0x1c4   : > { %1803 = vmatmul.mubr.bf16.gmra.mxu1 %v983_v59 }
 0x1c8   : > { %v1760_v9 = vpop.f32.mrf.mxu1 }
 0x1c9   : > { %v894_v34 = vadd.f32 %v1760_v9, %v2241_v5  ;;  %v1934_v9 = vld [vmem:[%s2467_s6 + $0x10] sm:$0xff]  }
 0x1ca   : > { %v885_v43 = vpop.f32.mrf.mxu1  ;;  %1840 = vmatprep.subr.bf16.mxu0 %v1934_v9 }
 0x1cb   : > { %v886_v50 = vadd.f32 %v2241_v5, %v885_v43  ;;  %1841 = vmatpush3.bf16.msra.mxu0 %v1934_v9 }
 0x1cc   : > { %v1761_v23 = vpop.f32.mrf.mxu1 }
 0x1cd   : > { %v897_v44 = vadd.f32 %v1761_v23, %v2241_v5  ;;  %v1935_v23 = vld [vmem:[%s2467_s6 + $0x8] sm:$0xff]  }
 0x1ce   : > { %v888_v47 = vpop.f32.mrf.mxu1  ;;  %1842 = vmatprep.subr.bf16.mxu0 %v1935_v23 }
 0x1cf   : > { %v889_v51 = vadd.f32 %v2241_v5, %v888_v47  ;;  %v985_v56 = vpack.c.bf16 %v897_v44, %v894_v34  ;;  %1843 = vmatpush3.bf16.msra.mxu0 %v1935_v23 }
 0x1d1   : > { %v984_v53 = vpack.c.bf16 %v889_v51, %v886_v50  ;;  %v1936_v50 = vld [vmem:[%s2467_s6] sm:$0xff]  }
 0x1d2   : > { %1844 = vmatprep.subr.bf16.mxu0 %v1936_v50 }
 0x1d3   : > { %1806 = vmatprep.mubr.bf16.mxu1 %v984_v53  ;;  %1845 = vmatpush3.bf16.msra.mxu0 %v1936_v50 }
 0x1d4   : > { %1807 = vmatmul.mubr.bf16.gmra.mxu1 %v985_v56 }
 0x1d8   : > { %v1764_v61 = vpop.f32.mrf.mxu1 }
 0x1d9   : > { %v910_v29 = vadd.f32 %v1764_v61, %v2241_v5 }
 0x1da   : > { %v901_v63 = vpop.f32.mrf.mxu1 }
 0x1db   : > { %v902_v10 = vadd.f32 %v2241_v5, %v901_v63 }
 0x1dc   : > { %v1765_v3 = vpop.f32.mrf.mxu1 }
 0x1dd   : > { %v913_v6 = vadd.f32 %v1765_v3, %v2241_v5 }
 0x1de   : > { %v904_v8 = vpop.f32.mrf.mxu1 }
 0x1df   : > { %v905_v13 = vadd.f32 %v2241_v5, %v904_v8  ;;  %v987_v14 = vpack.c.bf16 %v913_v6, %v910_v29 }
 0x1e1   : > { %v986_v46 = vpack.c.bf16 %v905_v13, %v902_v10 }
 0x1e3   : > { %1810 = vmatprep.mubr.bf16.mxu1 %v986_v46 }
 0x1e4   : > { %1811 = vmatmul.mubr.bf16.gmra.mxu1 %v987_v14 }
 0x1e8   : > { %v1768_v17 = vpop.f32.mrf.mxu1 }
 0x1e9   : > { %v926_v37 = vadd.f32 %v1768_v17, %v2241_v5 }
 0x1ea   : > { %v917_v19 = vpop.f32.mrf.mxu1 }
 0x1eb   : > { %v918_v28 = vadd.f32 %v2241_v5, %v917_v19 }
 0x1ec   : > { %v1769_v20 = vpop.f32.mrf.mxu1 }
 0x1ed   : > { %v929_v24 = vadd.f32 %v1769_v20, %v2241_v5 }
 0x1ee   : > { %v920_v26 = vpop.f32.mrf.mxu1 }
 0x1ef   : > { %v921_v30 = vadd.f32 %v2241_v5, %v920_v26  ;;  %v989_v59 = vpack.c.bf16 %v929_v24, %v926_v37 }
 0x1f1   : > { %v988_v39 = vpack.c.bf16 %v921_v30, %v918_v28 }
 0x1f3   : > { %1814 = vmatprep.mubr.bf16.mxu1 %v988_v39 }
 0x1f4   : > { %1815 = vmatmul.mubr.bf16.gmra.mxu1 %v989_v59 }
 0x1f8   : > { %v1772_v43 = vpop.f32.mrf.mxu1 }
 0x1f9   : > { %v942_v61 = vadd.f32 %v1772_v43, %v2241_v5 }
 0x1fa   : > { %v933_v44 = vpop.f32.mrf.mxu1 }
 0x1fb   : > { %v934_v53 = vadd.f32 %v2241_v5, %v933_v44  ;;  %v354_v44 = vsub.s32 1, %v2094_v31 }
 0x1fc   : > { %v1773_v47 = vpop.f32.mrf.mxu1 }
 0x1fd   : > { %v945_v51 = vadd.f32 %v1773_v47, %v2241_v5  ;;  %v2286_v47 = vrot.slane %v2100_v33, %v354_v44 }
 0x1fe   : > { %v936_v34 = vpop.f32.mrf.mxu1 }
 0x1ff   : > { %v937_v56 = vadd.f32 %v2241_v5, %v936_v34  ;;  %v991_v6 = vpack.c.bf16 %v945_v51, %v942_v61  ;;  %v554_v51 = vadd.f32 %v2111_v45, %v2286_v47 }
 0x200   : > { %v1776_v63 = vpop.f32.mrf.mxu1 }
 0x201   : > { %v990_v3 = vpack.c.bf16 %v937_v56, %v934_v53  ;;  %v958_v17 = vadd.f32 %v1776_v63, %v2241_v5  ;;  %v544_v53 = vadd.f32 %v2105_v36, %v2286_v47  ;;  %v548_v63 = vadd.f32 %v2109_v40, %v2286_v47 }
 0x202   : > { %v949_v8 = vpop.f32.mrf.mxu1  ;;  %v564_v40 = vadd.f32 %v2120_v55, %v2286_v47 }
 0x203   : > { %1818 = vmatprep.mubr.bf16.mxu1 %v990_v3  ;;  %v950_v46 = vadd.f32 %v2241_v5, %v949_v8 }
 0x204   : > { %v1777_v10 = vpop.f32.mrf.mxu1  ;;  %1819 = vmatmul.mubr.bf16.gmra.mxu1 %v991_v6 }
 0x205   : > { %v961_v13 = vadd.f32 %v1777_v10, %v2241_v5 }
 0x206   : > { %v952_v29 = vpop.f32.mrf.mxu1 }
 0x207   : > { %v953_v14 = vadd.f32 %v2241_v5, %v952_v29  ;;  %v993_v24 = vpack.c.bf16 %v961_v13, %v958_v17  ;;  %v578_v17 = vadd.f32 %v2139_v7, %v2286_v47  ;;  %v594_v7 = vadd.f32 %v2147_v21, %v2286_v47 }
 0x208   : > { %v1780_v19 = vpop.f32.mrf.mxu1 }
 0x209   : > { %v992_v20 = vpack.c.bf16 %v953_v14, %v950_v46  ;;  %v974_v9 = vadd.f32 %v1780_v19, %v2241_v5 }
 0x20a   : > { %v965_v26 = vpop.f32.mrf.mxu1 }
 0x20b   : > { %1822 = vmatprep.mubr.bf16.mxu1 %v992_v20  ;;  %v966_v39 = vadd.f32 %v2241_v5, %v965_v26 }
 0x20c   : > { %v1781_v28 = vpop.f32.mrf.mxu1  ;;  %1823 = vmatmul.mubr.bf16.gmra.mxu1 %v993_v24  ;;  %v568_v24 = vadd.f32 %v2127_v60, %v2286_v47  ;;  %v584_v60 = vadd.f32 %v2141_v12, %v2286_v47 }
 0x20d   : > { %v977_v30 = vadd.f32 %v1781_v28, %v2241_v5 }
 0x20e   : > { %v968_v37 = vpop.f32.mrf.mxu1 }
 0x20f   : > { %v969_v59 = vadd.f32 %v2241_v5, %v968_v37  ;;  %v995_v23 = vpack.c.bf16 %v977_v30, %v974_v9  ;;  %v558_v5 = vadd.f32 %v2115_v49, %v2286_v47  ;;  %v574_v49 = vadd.f32 %v2132_v2, %v2286_v47 }
 0x211   : > { %v994_v43 = vpack.c.bf16 %v969_v59, %v966_v39 }
 0x213   : > { %1826 = vmatprep.mubr.bf16.mxu1 %v994_v43 }
 0x214   : > { %1827 = vmatmul.mubr.bf16.gmra.mxu1 %v995_v23 }
 0x274   : > { %v1800_v50 = vpop.f32.mrf.mxu1 }
 0x275   : > { %v1103_v56 = vadd.f32 %v1800_v50, %v554_v51  ;;  %v598_v50 = vadd.f32 %v2151_v25, %v2286_v47  ;;  %v614_v25 = vadd.f32 %v2163_v48, %v2286_v47 }
 0x276   : > { %v1094_v34 = vpop.f32.mrf.mxu1 }
 0x277   : > { %v1095_v31 = vadd.f32 %v1094_v34, %v544_v53  ;;  %v1223_v6 = vmax.f32 %v1103_v56, 0.0  ;;  %v588_v53 = vadd.f32 %v2145_v16, %v2286_v47  ;;  %v604_v16 = vadd.f32 %v2155_v32, %v2286_v47 }
 0x278   : > { %v1801_v61 = vpop.f32.mrf.mxu1 }
 0x279   : > { %v1106_v3 = vadd.f32 %v1801_v61, %v558_v5  ;;  %v1221_v13 = vmax.f32 %v1095_v31, 0.0 }
 0x27a   : > { %v1097_v33 = vpop.f32.mrf.mxu1 }
 0x27b   : > { %v1224_v8 = vmax.f32 %v1106_v3, 0.0  ;;  %v1098_v10 = vadd.f32 %v1097_v33, %v548_v63 }
 0x27d   : > { %v1254_v45 = vpack.c.bf16 %v1224_v8, %v1223_v6  ;;  %v1222_v29 = vmax.f32 %v1098_v10, 0.0 }
 0x27f   : > { %v1253_v46 = vpack.c.bf16 %v1222_v29, %v1221_v13  ;;  %v618_v13 = vadd.f32 %v2169_v54, %v2286_v47  ;;  %v634_v54 = vadd.f32 %v2179_v11, %v2286_v47 }
 0x281   : > { %1846 = vmatprep.mubr.bf16.mxu0 %v1253_v46  ;;  %v608_v46 = vadd.f32 %v2161_v41, %v2286_v47  ;;  %v624_v41 = vadd.f32 %v2171_v62, %v2286_v47  ;;  %v657_v62 = vpop.f32.mrf.mxu0 }
 0x282   : > { %1847 = vmatmul.mubr.bf16.vlgmr.msra.gmra.mxu0 %v1254_v45 }
 0x284   : > { %v1804_v36 = vpop.f32.mrf.mxu1 }
 0x285   : > { %v1119_v19 = vadd.f32 %v1804_v36, %v574_v49 }
 0x286   : > { %v1110_v14 = vpop.f32.mrf.mxu1 }
 0x287   : > { %v1111_v26 = vadd.f32 %v1110_v14, %v564_v40  ;;  %v1227_v37 = vmax.f32 %v1119_v19, 0.0 }
 0x288   : > { %v1805_v20 = vpop.f32.mrf.mxu1 }
 0x289   : > { %v1122_v28 = vadd.f32 %v1805_v20, %v578_v17  ;;  %v1225_v9 = vmax.f32 %v1111_v26, 0.0 }
 0x28a   : > { %v1113_v30 = vpop.f32.mrf.mxu1 }
 0x28b   : > { %v1228_v39 = vmax.f32 %v1122_v28, 0.0  ;;  %v1114_v59 = vadd.f32 %v1113_v30, %v568_v24  ;;  %v638_v30 = vadd.f32 %v2185_v18, %v2286_v47 }
 0x28d   : > { %v1256_v2 = vpack.c.bf16 %v1228_v39, %v1227_v37  ;;  %v1226_v43 = vmax.f32 %v1114_v59, 0.0  ;;  %v628_v59 = vadd.f32 %v2177_v4, %v2286_v47  ;;  %v658_v4 = vadd.f32 %v657_v62, %v2286_v47 }
 0x28f   : > { %v1255_v23 = vpack.c.bf16 %v1226_v43, %v1225_v9 }
 0x291   : > { %1850 = vmatprep.mubr.bf16.mxu0 %v1255_v23 }
 0x292   : > { %1851 = vmatmul.mubr.bf16.gmra.mxu0 %v1256_v2 }
 0x294   : > { %v1808_v55 = vpop.f32.mrf.mxu1 }
 0x295   : > { %v1135_v51 = vadd.f32 %v1808_v55, %v594_v7 }
 0x296   : > { %v1126_v44 = vpop.f32.mrf.mxu1 }
 0x297   : > { %v1127_v5 = vadd.f32 %v1126_v44, %v584_v60  ;;  %v1231_v63 = vmax.f32 %v1135_v51, 0.0 }
 0x298   : > { %v1809_v34 = vpop.f32.mrf.mxu1 }
 0x299   : > { %v1138_v56 = vadd.f32 %v1809_v34, %v598_v50  ;;  %v1229_v33 = vmax.f32 %v1127_v5, 0.0  ;;  %v644_v34 = vadd.f32 %v2190_v27, %v2286_v47 }
 0x29a   : > { %v1129_v61 = vpop.f32.mrf.mxu1 }
 0x29b   : > { %v1232_v31 = vmax.f32 %v1138_v56, 0.0  ;;  %v1130_v3 = vadd.f32 %v1129_v61, %v588_v53  ;;  %v654_v53 = vadd.f32 %v2207_v58, %v2286_v47  ;;  %v648_v56 = vadd.f32 %v2199_v42, %v2286_v47 }
 0x29c   : > { %v664_v58 = vadd.f32 %v2158_v38, %v2286_v47  ;;  %v678_v42 = vadd.f32 %v2182_v15, %v2286_v47 }
 0x29d   : > { %v1258_v21 = vpack.c.bf16 %v1232_v31, %v1231_v63  ;;  %v1230_v6 = vmax.f32 %v1130_v3, 0.0 }
 0x29f   : > { %v1257_v8 = vpack.c.bf16 %v1230_v6, %v1229_v33 }
 0x2a1   : > { %1854 = vmatprep.mubr.bf16.mxu0 %v1257_v8  ;;  %v674_v8 = vadd.f32 %v2174_v1, %v2286_v47 }
 0x2a2   : > { %1855 = vmatmul.mubr.bf16.gmra.mxu0 %v1258_v21 }
 0x2a4   : > { %v1812_v12 = vpop.f32.mrf.mxu1 }
 0x2a5   : > { %v1151_v45 = vadd.f32 %v1812_v12, %v614_v25 }
 0x2a6   : > { %v1142_v10 = vpop.f32.mrf.mxu1 }
 0x2a7   : > { %v1143_v36 = vadd.f32 %v1142_v10, %v604_v16  ;;  %v1235_v40 = vmax.f32 %v1151_v45, 0.0 }
 0x2a8   : > { %v1813_v29 = vpop.f32.mrf.mxu1 }
 0x2a9   : > { %v1154_v49 = vadd.f32 %v1813_v29, %v618_v13  ;;  %v1233_v20 = vmax.f32 %v1143_v36, 0.0 }
 0x2aa   : > { %v1145_v14 = vpop.f32.mrf.mxu1 }
 0x2ab   : > { %v1236_v17 = vmax.f32 %v1154_v49, 0.0  ;;  %v1146_v19 = vadd.f32 %v1145_v14, %v608_v46  ;;  %v668_v46 = vadd.f32 %v2166_v52, %v2286_v47 }
 0x2ad   : > { %v1260_v48 = vpack.c.bf16 %v1236_v17, %v1235_v40  ;;  %v1234_v24 = vmax.f32 %v1146_v19, 0.0 }
 0x2af   : > { %v1259_v26 = vpack.c.bf16 %v1234_v24, %v1233_v20  ;;  %v684_v24 = vadd.f32 %v2193_v35, %v2286_v47 }
 0x2b1   : > { %1858 = vmatprep.mubr.bf16.mxu0 %v1259_v26  ;;  %v698_v26 = vadd.f32 %v2236_v57, %v2286_v47 }
 0x2b2   : > { %1859 = vmatmul.mubr.bf16.gmra.mxu0 %v1260_v48 }
 0x2b4   : > { %v1816_v32 = vpop.f32.mrf.mxu1 }
 0x2b5   : > { %v1167_v37 = vadd.f32 %v1816_v32, %v634_v54  ;;  %v694_v32 = vadd.f32 %v2217_v22, %v2286_v47 }
 0x2b6   : > { %v1158_v28 = vpop.f32.mrf.mxu1 }
 0x2b7   : > { %v1159_v9 = vadd.f32 %v1158_v28, %v624_v41  ;;  %v1239_v23 = vmax.f32 %v1167_v37, 0.0  ;;  %v688_v28 = vadd.f32 %v2210_v0, %v2286_v47  ;;  %v2355_v0 = vld [vmem:[%s2468_s7] ss:$0 sm:$0xff] }
 0x2b8   : > { %v1817_v39 = vpop.f32.mrf.mxu1 }
 0x2b9   : > { %v1170_v2 = vadd.f32 %v1817_v39, %v638_v30  ;;  %v1237_v44 = vmax.f32 %v1159_v9, 0.0 }
 0x2ba   : > { %v1161_v43 = vpop.f32.mrf.mxu1 }
 0x2bb   : > { %v1240_v55 = vmax.f32 %v1170_v2, 0.0  ;;  %v1162_v7 = vadd.f32 %v1161_v43, %v628_v59 }
 0x2bd   : > { %v1262_v11 = vpack.c.bf16 %v1240_v55, %v1239_v23  ;;  %v1238_v60 = vmax.f32 %v1162_v7, 0.0 }
 0x2bf   : > { %v1261_v50 = vpack.c.bf16 %v1238_v60, %v1237_v44 }
 0x2c1   : > { %1862 = vmatprep.mubr.bf16.mxu0 %v1261_v50 }
 0x2c2   : > { %1863 = vmatmul.mubr.bf16.gmra.mxu0 %v1262_v11 }
 0x2c4   : > { %v1820_v51 = vpop.f32.mrf.mxu1 }
 0x2c5   : > { %v1183_v31 = vadd.f32 %v1820_v51, %v654_v53 }
 0x2c6   : > { %v1174_v18 = vpop.f32.mrf.mxu1 }
 0x2c7   : > { %v1175_v61 = vadd.f32 %v1174_v18, %v644_v34  ;;  %v1243_v25 = vmax.f32 %v1183_v31, 0.0 }
 0x2c8   : > { %v1821_v5 = vpop.f32.mrf.mxu1 }
 0x2c9   : > { %v1186_v63 = vadd.f32 %v1821_v5, %v658_v4  ;;  %v1241_v27 = vmax.f32 %v1175_v61, 0.0 }
 0x2ca   : > { %v1177_v3 = vpop.f32.mrf.mxu1 }
 0x2cb   : > { %v1178_v33 = vadd.f32 %v1177_v3, %v648_v56  ;;  %v1244_v21 = vmax.f32 %v1186_v63, 0.0 }
 0x2cc   : > { %v1824_v6 = vpop.f32.mrf.mxu1 }
 0x2cd   : > { %v1242_v12 = vmax.f32 %v1178_v33, 0.0  ;;  %v1199_v13 = vadd.f32 %v1824_v6, %v674_v8  ;;  %v1264_v45 = vpack.c.bf16 %v1244_v21, %v1243_v25 }
 0x2ce   : > { %v1190_v10 = vpop.f32.mrf.mxu1 }
 0x2cf   : > { %v1263_v16 = vpack.c.bf16 %v1242_v12, %v1241_v27  ;;  %v1191_v36 = vadd.f32 %v1190_v10, %v664_v58  ;;  %v1247_v14 = vmax.f32 %v1199_v13, 0.0 }
 0x2d0   : > { %v1825_v29 = vpop.f32.mrf.mxu1 }
 0x2d1   : > { %v1202_v49 = vadd.f32 %v1825_v29, %v678_v42  ;;  %1866 = vmatprep.mubr.bf16.mxu0 %v1263_v16  ;;  %v1245_v38 = vmax.f32 %v1191_v36, 0.0 }
 0x2d2   : > { %v1193_v1 = vpop.f32.mrf.mxu1  ;;  %1867 = vmatmul.mubr.bf16.gmra.mxu0 %v1264_v45 }
 0x2d3   : > { %v1248_v40 = vmax.f32 %v1202_v49, 0.0  ;;  %v1194_v17 = vadd.f32 %v1193_v1, %v668_v46 }
 0x2d4   : > { %v1828_v19 = vpop.f32.mrf.mxu1 }
 0x2d5   : > { %v1266_v20 = vpack.c.bf16 %v1248_v40, %v1247_v14  ;;  %v1246_v48 = vmax.f32 %v1194_v17, 0.0  ;;  %v1215_v37 = vadd.f32 %v1828_v19, %v694_v32 }
 0x2d6   : > { %v1206_v15 = vpop.f32.mrf.mxu1 }
 0x2d7   : > { %v1265_v52 = vpack.c.bf16 %v1246_v48, %v1245_v38  ;;  %v1207_v41 = vadd.f32 %v1206_v15, %v684_v24  ;;  %v1251_v57 = vmax.f32 %v1215_v37, 0.0 }
 0x2d8   : > { %v1829_v54 = vpop.f32.mrf.mxu1 }
 0x2d9   : > { %v1218_v30 = vadd.f32 %v1829_v54, %v698_v26  ;;  %1870 = vmatprep.mubr.bf16.mxu0 %v1265_v52  ;;  %v1249_v9 = vmax.f32 %v1207_v41, 0.0 }
 0x2da   : > { %v1209_v39 = vpop.f32.mrf.mxu1  ;;  %1871 = vmatmul.mubr.bf16.gmra.mxu0 %v1266_v20 }
 0x2db   : > { %v1210_v59 = vadd.f32 %v1209_v39, %v688_v28  ;;  %v1252_v35 = vmax.f32 %v1218_v30, 0.0 }
 0x2dd   : > { %v1250_v2 = vmax.f32 %v1210_v59, 0.0  ;;  %v1268_v23 = vpack.c.bf16 %v1252_v35, %v1251_v57 }
 0x2df   : > { %v1267_v43 = vpack.c.bf16 %v1250_v2, %v1249_v9 }
 0x2e1   : > { %1874 = vmatprep.mubr.bf16.mxu0 %v1267_v43 }
 0x2e2   : > { %1875 = vmatmul.mubr.bf16.gmra.mxu0 %v1268_v23 }
 0x342   : > { %v1848_v22 = vpop.f32.mrf.mxu0 }
 0x343   : > { %v1383_v47 = vadd.f32 %v1848_v22, %v2355_v0 }
 0x344   : > { %v1374_v55 = vpop.f32.mrf.mxu0 }
 0x345   : > { %1503 = vst.msk [vmem:[%s2360_s17 + $0x10] sm:$0xff] %vm458_vm0, %v1383_v47  ;;  %v1375_v7 = vadd.f32 %v2355_v0, %v1374_v55 }
 0x346   : > { %v1849_v44 = vpop.f32.mrf.mxu0 }
 0x347   : > { %1501 = vst.msk [vmem:[%s2360_s17] sm:$0xff] %vm458_vm0, %v1375_v7  ;;  %v1386_v11 = vadd.f32 %v1849_v44, %v2355_v0 }
 0x348   : > { %v1377_v60 = vpop.f32.mrf.mxu0 }
 0x349   : > { %1504 = vst.msk [vmem:[%s2360_s17 + $0x18] sm:$0xff] %vm458_vm0, %v1386_v11  ;;  %v1378_v50 = vadd.f32 %v2355_v0, %v1377_v60 }
 0x34b   : > { %1502 = vst.msk [vmem:[%s2360_s17 + $0x8] sm:$0xff] %vm458_vm0, %v1378_v50 }
 0x352   : > { %v1852_v62 = vpop.f32.mrf.mxu0 }
 0x353   : > { %v1399_v51 = vadd.f32 %v1852_v62, %v2355_v0 }
 0x354   : > { %v1390_v18 = vpop.f32.mrf.mxu0 }
 0x355   : > { %1507 = vst.msk [vmem:[%s2360_s17 + $0x30] sm:$0xff] %vm458_vm0, %v1399_v51  ;;  %v1391_v34 = vadd.f32 %v2355_v0, %v1390_v18 }
 0x356   : > { %v1853_v4 = vpop.f32.mrf.mxu0 }
 0x357   : > { %1505 = vst.msk [vmem:[%s2360_s17 + $0x20] sm:$0xff] %vm458_vm0, %v1391_v34  ;;  %v1402_v53 = vadd.f32 %v1853_v4, %v2355_v0 }
 0x358   : > { %v1393_v5 = vpop.f32.mrf.mxu0 }
 0x359   : > { %1508 = vst.msk [vmem:[%s2360_s17 + $0x38] sm:$0xff] %vm458_vm0, %v1402_v53  ;;  %v1394_v56 = vadd.f32 %v2355_v0, %v1393_v5 }
 0x35b   : > { %1506 = vst.msk [vmem:[%s2360_s17 + $0x28] sm:$0xff] %vm458_vm0, %v1394_v56 }
 0x362   : > { %v1856_v61 = vpop.f32.mrf.mxu0 }
 0x363   : > { %v1415_v63 = vadd.f32 %v1856_v61, %v2355_v0 }
 0x364   : > { %v1406_v31 = vpop.f32.mrf.mxu0 }
 0x365   : > { %1511 = vst.msk [vmem:[%s2360_s17 + $0x50] sm:$0xff] %vm458_vm0, %v1415_v63  ;;  %v1407_v3 = vadd.f32 %v2355_v0, %v1406_v31 }
 0x366   : > { %v1857_v33 = vpop.f32.mrf.mxu0 }
 0x367   : > { %1509 = vst.msk [vmem:[%s2360_s17 + $0x40] sm:$0xff] %vm458_vm0, %v1407_v3  ;;  %v1418_v21 = vadd.f32 %v1857_v33, %v2355_v0 }
 0x368   : > { %v1409_v6 = vpop.f32.mrf.mxu0 }
 0x369   : > { %1512 = vst.msk [vmem:[%s2360_s17 + $0x58] sm:$0xff] %vm458_vm0, %v1418_v21  ;;  %v1410_v8 = vadd.f32 %v2355_v0, %v1409_v6 }
 0x36b   : > { %1510 = vst.msk [vmem:[%s2360_s17 + $0x48] sm:$0xff] %vm458_vm0, %v1410_v8 }
 0x372   : > { %v1860_v27 = vpop.f32.mrf.mxu0 }
 0x373   : > { %v1431_v12 = vadd.f32 %v1860_v27, %v2355_v0 }
 0x374   : > { %v1422_v25 = vpop.f32.mrf.mxu0 }
 0x375   : > { %1515 = vst.msk [vmem:[%s2360_s17 + $0x70] sm:$0xff] %vm458_vm0, %v1431_v12  ;;  %v1423_v10 = vadd.f32 %v2355_v0, %v1422_v25 }
 0x376   : > { %v1861_v58 = vpop.f32.mrf.mxu0 }
 0x377   : > { %1513 = vst.msk [vmem:[%s2360_s17 + $0x60] sm:$0xff] %vm458_vm0, %v1423_v10  ;;  %v1434_v42 = vadd.f32 %v1861_v58, %v2355_v0 }
 0x378   : > { %v1425_v16 = vpop.f32.mrf.mxu0 }
 0x379   : > { %1516 = vst.msk [vmem:[%s2360_s17 + $0x78] sm:$0xff] %vm458_vm0, %v1434_v42  ;;  %v1426_v13 = vadd.f32 %v2355_v0, %v1425_v16 }
 0x37b   : > { %1514 = vst.msk [vmem:[%s2360_s17 + $0x68] sm:$0xff] %vm458_vm0, %v1426_v13 }
 0x382   : > { %v1864_v45 = vpop.f32.mrf.mxu0 }
 0x383   : > { %v1447_v29 = vadd.f32 %v1864_v45, %v2355_v0 }
 0x384   : > { %v1438_v46 = vpop.f32.mrf.mxu0 }
 0x385   : > { %1519 = vst.msk [vmem:[%s2360_s17 + $0x90] sm:$0xff] %vm458_vm0, %v1447_v29  ;;  %v1439_v36 = vadd.f32 %v2355_v0, %v1438_v46 }
 0x386   : > { %v1865_v49 = vpop.f32.mrf.mxu0 }
 0x387   : > { %1517 = vst.msk [vmem:[%s2360_s17 + $0x80] sm:$0xff] %vm458_vm0, %v1439_v36  ;;  %v1450_v1 = vadd.f32 %v1865_v49, %v2355_v0 }
 0x388   : > { %v1441_v14 = vpop.f32.mrf.mxu0 }
 0x389   : > { %1520 = vst.msk [vmem:[%s2360_s17 + $0x98] sm:$0xff] %vm458_vm0, %v1450_v1  ;;  %v1442_v40 = vadd.f32 %v2355_v0, %v1441_v14 }
 0x38b   : > { %1518 = vst.msk [vmem:[%s2360_s17 + $0x88] sm:$0xff] %vm458_vm0, %v1442_v40 }
 0x392   : > { %v1868_v17 = vpop.f32.mrf.mxu0 }
 0x393   : > { %v1463_v19 = vadd.f32 %v1868_v17, %v2355_v0 }
 0x394   : > { %v1454_v38 = vpop.f32.mrf.mxu0 }
 0x395   : > { %1523 = vst.msk [vmem:[%s2360_s17 + $0xb0] sm:$0xff] %vm458_vm0, %v1463_v19  ;;  %v1455_v20 = vadd.f32 %v2355_v0, %v1454_v38 }
 0x396   : > { %v1869_v48 = vpop.f32.mrf.mxu0 }
 0x397   : > { %1521 = vst.msk [vmem:[%s2360_s17 + $0xa0] sm:$0xff] %vm458_vm0, %v1455_v20  ;;  %v1466_v15 = vadd.f32 %v1869_v48, %v2355_v0 }
 0x398   : > { %v1457_v24 = vpop.f32.mrf.mxu0 }
 0x399   : > { %1524 = vst.msk [vmem:[%s2360_s17 + $0xb8] sm:$0xff] %vm458_vm0, %v1466_v15  ;;  %v1458_v26 = vadd.f32 %v2355_v0, %v1457_v24 }
 0x39a   : > { %v1872_v52 = vpop.f32.mrf.mxu0 }
 0x39b   : > { %1522 = vst.msk [vmem:[%s2360_s17 + $0xa8] sm:$0xff] %vm458_vm0, %v1458_v26  ;;  %v1479_v32 = vadd.f32 %v1872_v52, %v2355_v0 }
 0x39c   : > { %v1470_v54 = vpop.f32.mrf.mxu0 }
 0x39d   : > { %1527 = vst.msk [vmem:[%s2360_s17 + $0xd0] sm:$0xff] %vm458_vm0, %v1479_v32  ;;  %v1471_v28 = vadd.f32 %v2355_v0, %v1470_v54 }
 0x39e   : > { %v1873_v41 = vpop.f32.mrf.mxu0 }
 0x39f   : > { %1525 = vst.msk [vmem:[%s2360_s17 + $0xc0] sm:$0xff] %vm458_vm0, %v1471_v28  ;;  %v1482_v30 = vadd.f32 %v1873_v41, %v2355_v0 }
 0x3a0   : > { %v1473_v37 = vpop.f32.mrf.mxu0 }
 0x3a1   : > { %1528 = vst.msk [vmem:[%s2360_s17 + $0xd8] sm:$0xff] %vm458_vm0, %v1482_v30  ;;  %v1474_v39 = vadd.f32 %v2355_v0, %v1473_v37 }
 0x3a2   : > { %v1876_v59 = vpop.f32.mrf.mxu0 }
 0x3a3   : > { %1526 = vst.msk [vmem:[%s2360_s17 + $0xc8] sm:$0xff] %vm458_vm0, %v1474_v39  ;;  %v1495_v35 = vadd.f32 %v1876_v59, %v2355_v0 }
 0x3a4   : > { %v1486_v9 = vpop.f32.mrf.mxu0 }
 0x3a5   : > { %1531 = vst.msk [vmem:[%s2360_s17 + $0xf0] sm:$0xff] %vm458_vm0, %v1495_v35  ;;  %v1487_v2 = vadd.f32 %v2355_v0, %v1486_v9 }
 0x3a6   : > { %v1877_v57 = vpop.f32.mrf.mxu0 }
 0x3a7   : > { %1529 = vst.msk [vmem:[%s2360_s17 + $0xe0] sm:$0xff] %vm458_vm0, %v1487_v2  ;;  %v1498_v43 = vadd.f32 %v1877_v57, %v2355_v0 }
 0x3a8   : > { %v1489_v23 = vpop.f32.mrf.mxu0 }
 0x3a9   : > { %1532 = vst.msk [vmem:[%s2360_s17 + $0xf8] sm:$0xff] %vm458_vm0, %v1498_v43  ;;  %v1490_v22 = vadd.f32 %v2355_v0, %v1489_v23 }
 0x3ab   : > { %1530 = vst.msk [vmem:[%s2360_s17 + $0xe8] sm:$0xff] %vm458_vm0, %v1490_v22 }
 0x3ac PF: > { %s18_s27 = sadd.s32 1, %s1943_s27  }
 0x3ad   : > { %p15_p4 = scmp.ge.s32.totalorder %s18_s27, 4  }
 0x3af   :  { %17 = sbr.rel (!%p15_p4) target bundleno = 1 (0x1), region = 82 }

</bundles_post_ra>
